<compile_context>
chip_gen: v5e
topology: v5e:2x2
jax: 0.10.0
libtpu: 0.0.40
codegen_flags: <defaults>
</compile_context>

<pallas_src>
import math

import jax
import jax.numpy as jnp
from jax.experimental import pallas as pl
from jax.experimental.pallas import tpu as pltpu

STATE_DIM = 8
HIDDEN = 128
ACTION_N = 4
OUT_ROWS = 8          # logits rows padded 4 -> 8 (sublane-dense, negligible cost)
MAX_TILE = 8192       # batch tile on the lane axis; multiple of 128 (sweepable 2048-8192)


def _round_up(n, m):
    return ((n + m - 1) // m) * m


def _cdiv(a, b):
    return -(-a // b)


def _choose_tile(batch):
    # Lane-major batch tiling: multiple of 128, >= 2 tiles when possible so both
    # v7x TensorCores get work, capped so double-buffered blocks + the (128, tb)
    # f32 hidden temporary stay far below VMEM on every generation.
    if batch <= 128:
        return 128
    n_tiles = max(2, _cdiv(batch, MAX_TILE))
    return min(MAX_TILE, _round_up(_cdiv(batch, n_tiles), 128))


def _mlp_kernel(xT_ref, w1T_ref, b1_ref, w2T_ref, b2_ref, o_ref):
    # Transposed chain (batch on the lane axis), f32 accumulation on the MXU.
    xT = xT_ref[...]                                                   # (8, tb) bf16
    h = jnp.dot(w1T_ref[...], xT, preferred_element_type=jnp.float32)  # (128, tb) f32
    h = jnp.maximum(h + b1_ref[...], 0.0)
    y = jnp.dot(w2T_ref[...], h.astype(jnp.bfloat16),
                preferred_element_type=jnp.float32) + b2_ref[...]      # (8, tb) f32
    o_ref[...] = y.astype(o_ref.dtype)                                 # full-lane unmasked store


@jax.jit
def cem_forward(x, params):
    """x: (B, STATE_DIM) f32 -> logits (B, ACTION_N) f32."""
    w1T, b1c, w2Tp, b2cp = params
    B = x.shape[0]
    tb = _choose_tile(B)
    b_pad = _round_up(B, tb)

    # Batch on the lane axis; bf16 MXU inputs; zero-pad ragged batch columns
    # (garbage columns are sliced away below).
    xT = jnp.pad(x.T.astype(jnp.bfloat16), ((0, 0), (0, b_pad - B)))

    grid = (b_pad // tb,)

    flops = 2 * b_pad * (STATE_DIM * HIDDEN + HIDDEN * OUT_ROWS)
    bytes_accessed = (
        2 * STATE_DIM * b_pad                               # x in (bf16)
        + 4 * OUT_ROWS * b_pad                              # logits out (f32)
        + 2 * (HIDDEN * STATE_DIM + OUT_ROWS * HIDDEN)      # weights (bf16)
        + 4 * (HIDDEN + OUT_ROWS)                           # biases (f32)
    )

    out = pl.pallas_call(
        _mlp_kernel,
        out_shape=jax.ShapeDtypeStruct((OUT_ROWS, b_pad), jnp.float32),
        grid=grid,
        in_specs=[
            pl.BlockSpec((STATE_DIM, tb), lambda i: (0, i)),     # x^T: tiled over batch lanes
            pl.BlockSpec((HIDDEN, STATE_DIM), lambda i: (0, 0)), # w1^T: resident
            pl.BlockSpec((HIDDEN, 1), lambda i: (0, 0)),         # b1 column: resident
            pl.BlockSpec((OUT_ROWS, HIDDEN), lambda i: (0, 0)),  # w2^T (padded rows): resident
            pl.BlockSpec((OUT_ROWS, 1), lambda i: (0, 0)),       # b2 column (padded): resident
        ],
        out_specs=pl.BlockSpec((OUT_ROWS, tb), lambda i: (0, i)),
        compiler_params=pltpu.CompilerParams(
            dimension_semantics=("parallel",),  # megacore sharding of batch tiles on v7x
        ),
        cost_estimate=pl.CostEstimate(
            flops=flops, transcendentals=0, bytes_accessed=bytes_accessed
        ),
    )(xT, w1T, b1c, w2Tp, b2cp)

    # Drop padded logits rows and padded batch columns; back to (B, ACTION_N).
    return out[:ACTION_N, :B].T


def init_params(key):
    # Deterministic init mimicking PyTorch nn.Linear default:
    # U(-1/sqrt(fan_in), 1/sqrt(fan_in)); math-layout (in, out) weights.
    k1, k2, k3, k4 = jax.random.split(key, 4)
    bound1 = 1.0 / math.sqrt(STATE_DIM)
    bound2 = 1.0 / math.sqrt(HIDDEN)
    w1 = jax.random.uniform(k1, (STATE_DIM, HIDDEN), jnp.float32, -bound1, bound1)
    b1 = jax.random.uniform(k2, (HIDDEN,), jnp.float32, -bound1, bound1)
    w2 = jax.random.uniform(k3, (HIDDEN, ACTION_N), jnp.float32, -bound2, bound2)
    b2 = jax.random.uniform(k4, (ACTION_N,), jnp.float32, -bound2, bound2)
    return w1, b1, w2, b2


def prep_params(w1, b1, w2, b2):
    # One-time layout/dtype prep (at init, not per call):
    #  - weights transposed to (out, in) and cast to bf16 for the MXU,
    #  - second layer zero-padded 4 -> 8 output rows (sublane-dense),
    #  - biases kept f32, shaped as columns to broadcast over the lane (batch) axis.
    w1T = w1.T.astype(jnp.bfloat16)                                                   # (128, 8)
    b1c = b1.reshape(HIDDEN, 1)                                                       # (128, 1)
    w2Tp = jnp.pad(w2.T, ((0, OUT_ROWS - ACTION_N), (0, 0))).astype(jnp.bfloat16)     # (8, 128)
    b2cp = jnp.pad(b2.reshape(ACTION_N, 1), ((0, OUT_ROWS - ACTION_N), (0, 0)))       # (8, 1)
    return w1T, b1c, w2Tp, b2cp


if __name__ == "__main__":
    key = jax.random.PRNGKey(0)
    k_params, k_x = jax.random.split(key)
    w1, b1, w2, b2 = init_params(k_params)
    params = prep_params(w1, b1, w2, b2)

    def ref_forward(xx):
        # Plain-JAX f32 reference (same math as the PyTorch forward).
        return jnp.maximum(xx @ w1 + b1, 0.0) @ w2 + b2

    # Small ragged batch (single grid step).
    batch = 6
    x = jax.random.normal(k_x, (batch, STATE_DIM), jnp.float32)
    logits = jax.block_until_ready(cem_forward(x, params))
    assert logits.shape == (batch, ACTION_N)
    # bf16 MXU inputs -> loosened tolerance vs the f32 reference.
    assert jnp.allclose(logits, ref_forward(x), atol=5e-2, rtol=5e-2)

    # Multi-tile batch (grid > 1) to exercise tiling / megacore path.
    big = 1031  # ragged vs the 640-lane tile chosen for this size
    xb = jax.random.normal(jax.random.PRNGKey(1), (big, STATE_DIM), jnp.float32)
    logits_b = jax.block_until_ready(cem_forward(xb, params))
    assert logits_b.shape == (big, ACTION_N)
    assert jnp.allclose(logits_b, ref_forward(xb), atol=5e-2, rtol=5e-2)

    # TODO(synk): softmax/action sampling (get_action) and the Adam/CrossEntropy
    # training step (fit) are host-side/training logic, not part of forward().

    print("KERNEL_OK")
</pallas_src>

<mosaic_0001>
module attributes {stable_mosaic.version = 11 : i64} {
  func.func @_mlp_kernel(%arg0: i32, %arg1: memref<8x128xbf16, #tpu.memory_space<vmem>>, %arg2: memref<128x8xbf16, #tpu.memory_space<vmem>>, %arg3: memref<128x1xf32, #tpu.memory_space<vmem>>, %arg4: memref<8x128xbf16, #tpu.memory_space<vmem>>, %arg5: memref<8x1xf32, #tpu.memory_space<vmem>>, %arg6: memref<8x128xf32, #tpu.memory_space<vmem>>) attributes {dimension_semantics = [#tpu.dimension_semantics<parallel>], iteration_bounds = array<i64: 1>, scalar_prefetch = 0 : i64, scratch_operands = 0 : i64, tpu.core_type = #tpu.core_type<tc>, window_params = [{transform_indices = @transform_0, window_bounds = array<i64: 8, 128>}, {pipeline_mode = #tpu.pipeline_mode<synchronous>, transform_indices = @transform_1, window_bounds = array<i64: 128, 8>}, {pipeline_mode = #tpu.pipeline_mode<synchronous>, transform_indices = @transform_2, window_bounds = array<i64: 128, 1>}, {pipeline_mode = #tpu.pipeline_mode<synchronous>, transform_indices = @transform_3, window_bounds = array<i64: 8, 128>}, {pipeline_mode = #tpu.pipeline_mode<synchronous>, transform_indices = @transform_4, window_bounds = array<i64: 8, 1>}, {transform_indices = @transform_5, window_bounds = array<i64: 8, 128>}]} {
    %c0 = arith.constant 0 : index
    %c0_0 = arith.constant 0 : index
    %0 = vector.load %arg1[%c0, %c0_0] : memref<8x128xbf16, #tpu.memory_space<vmem>>, vector<8x128xbf16>
    %c0_1 = arith.constant 0 : index
    %c0_2 = arith.constant 0 : index
    %1 = vector.load %arg2[%c0_1, %c0_2] : memref<128x8xbf16, #tpu.memory_space<vmem>>, vector<128x8xbf16>
    %cst = arith.constant dense<0.000000e+00> : vector<128x128xf32>
    %2 = tpu.matmul %1, %0, %cst {dimension_numbers = #tpu.dot_dimension_numbers<[1], [0], [0], [1], [0, 0, 1, 1], [], []>} : vector<128x8xbf16>, vector<8x128xbf16>, vector<128x128xf32> -> vector<128x128xf32>
    %c0_3 = arith.constant 0 : index
    %c0_4 = arith.constant 0 : index
    %3 = vector.load %arg3[%c0_3, %c0_4] : memref<128x1xf32, #tpu.memory_space<vmem>>, vector<128x1xf32>
    %4 = vector.broadcast %3 : vector<128x1xf32> to vector<128x128xf32>
    %5 = arith.addf %2, %4 : vector<128x128xf32>
    %cst_5 = arith.constant 0.000000e+00 : f32
    %6 = vector.broadcast %cst_5 : f32 to vector<128x128xf32>
    %7 = arith.maximumf %5, %6 : vector<128x128xf32>
    %c0_6 = arith.constant 0 : index
    %c0_7 = arith.constant 0 : index
    %8 = vector.load %arg4[%c0_6, %c0_7] : memref<8x128xbf16, #tpu.memory_space<vmem>>, vector<8x128xbf16>
    %9 = arith.truncf %7 : vector<128x128xf32> to vector<128x128xbf16>
    %cst_8 = arith.constant dense<0.000000e+00> : vector<8x128xf32>
    %10 = tpu.matmul %8, %9, %cst_8 {dimension_numbers = #tpu.dot_dimension_numbers<[1], [0], [0], [1], [0, 0, 1, 1], [], []>} : vector<8x128xbf16>, vector<128x128xbf16>, vector<8x128xf32> -> vector<8x128xf32>
    %c0_9 = arith.constant 0 : index
    %c0_10 = arith.constant 0 : index
    %11 = vector.load %arg5[%c0_9, %c0_10] : memref<8x1xf32, #tpu.memory_space<vmem>>, vector<8x1xf32>
    %12 = vector.broadcast %11 : vector<8x1xf32> to vector<8x128xf32>
    %13 = arith.addf %10, %12 : vector<8x128xf32>
    %c0_11 = arith.constant 0 : index
    %c0_12 = arith.constant 0 : index
    %14 = vector.load %arg6[%c0_11, %c0_12] : memref<8x128xf32, #tpu.memory_space<vmem>>, vector<8x128xf32>
    tpu.vector_store %arg6[%c0_11, %c0_12], %13 {strides = array<i32>} : memref<8x128xf32, #tpu.memory_space<vmem>>, vector<8x128xf32>,
    return
  }
  func.func @transform_0(%arg0: i32) -> (i32, i32) {
    %c0_i32 = arith.constant 0 : i32
    %c0_i32_0 = arith.constant 0 : i32
    return %c0_i32, %arg0 : i32, i32
  }
  func.func @transform_1(%arg0: i32) -> (i32, i32) {
    %c0_i32 = arith.constant 0 : i32
    %c0_i32_0 = arith.constant 0 : i32
    %c0_i32_1 = arith.constant 0 : i32
    return %c0_i32, %c0_i32_0 : i32, i32
  }
  func.func @transform_2(%arg0: i32) -> (i32, i32) {
    %c0_i32 = arith.constant 0 : i32
    %c0_i32_0 = arith.constant 0 : i32
    %c0_i32_1 = arith.constant 0 : i32
    return %c0_i32, %c0_i32_0 : i32, i32
  }
  func.func @transform_3(%arg0: i32) -> (i32, i32) {
    %c0_i32 = arith.constant 0 : i32
    %c0_i32_0 = arith.constant 0 : i32
    %c0_i32_1 = arith.constant 0 : i32
    return %c0_i32, %c0_i32_0 : i32, i32
  }
  func.func @transform_4(%arg0: i32) -> (i32, i32) {
    %c0_i32 = arith.constant 0 : i32
    %c0_i32_0 = arith.constant 0 : i32
    %c0_i32_1 = arith.constant 0 : i32
    return %c0_i32, %c0_i32_0 : i32, i32
  }
  func.func @transform_5(%arg0: i32) -> (i32, i32) {
    %c0_i32 = arith.constant 0 : i32
    %c0_i32_0 = arith.constant 0 : i32
    return %c0_i32, %arg0 : i32, i32
  }
}

</mosaic_0001>

<bundles_post_ra>
// kernel: cem_forward.1
= control target key start
LH: loop header
LB: loop body
LE: loop exit
PB: predicated region body
PF: predicated region fallthrough
CT: control target
= control target key end

     0   :  { %vm199_vm0 = vcmask 1043456   ;;  %v355_v0 = vmov 0   ;;  %vm174_vm1 = vcmask 64512   ;;  %s484_s2 = inlined_call_operand.vmem [shape: f32[128,1], index: 2, kind: input, shape index: {}]   ;;  %s485_s0 = inlined_call_operand.vmem [shape: bf16[8,128], index: 0, kind: input, shape index: {}]   ;;  %s486_s1 = inlined_call_operand.vmem [shape: bf16[128,8], index: 1, kind: input, shape index: {}]   ;;  %s487_s4 = inlined_call_operand.vmem [shape: f32[8,1], index: 4, kind: input, shape index: {}]   ;;  %s488_s3 = inlined_call_operand.vmem [shape: bf16[8,128], index: 3, kind: input, shape index: {}]   ;;  %s489_s5 = inlined_call_operand.vmem [shape: f32[8,128], index: 5, kind: output, shape index: {}]  }
   0x1   :  { %352 = vset.pattern.permute.xlu0 %v355_v0  ;;  %v52_v1 = vld [vmem:[%s484_s2 + $0x70] sm:$0xff]  ;;  %v21_v2 = vld [vmem:[%s485_s0] sm:$0xf]  ;;  %353 = vset.pattern.permute.xlu1 %v355_v0  ;;  %v344_v5 = vld [vmem:[%s486_s1 + $0x18] sm:$0xff] }
   0x2   :  { %126 = vperm.xlu0 %352, %v52_v1   ;;  %v201_v3 = vsel %vm199_vm0, %v21_v2, 0  ;;  %v341_v4 = vld [vmem:[%s486_s1] sm:$0xff]  ;;  %354 = vset.pattern.permute.xlu2 %v355_v0  ;;  %v347_v7 = vld [vmem:[%s486_s1 + $0x30] sm:$0xff]  ;;  %v53_v9 = vld [vmem:[%s484_s2 + $0x78] sm:$0xff] }
   0x3   :  { %v50_v6 = vld [vmem:[%s484_s2 + $0x60] sm:$0xff]  ;;  %210 = vmatpush.bf16.msra.mxu0 %v201_v3  ;;  %349 = vmatpush.bf16.msra.mxu2 %v201_v3  ;;  %v48_v8 = vld [vmem:[%s484_s2 + $0x50] sm:$0xff]  ;;  %v51_v10 = vld [vmem:[%s484_s2 + $0x68] sm:$0xff] }
   0x4   :  { %350 = vmatpush.bf16.msra.mxu3 %v201_v3  ;;  %116 = vperm.xlu1 %353, %v50_v6   ;;  %v49_v11 = vld [vmem:[%s484_s2 + $0x58] sm:$0xff]  ;;  %v46_v12 = vld [vmem:[%s484_s2 + $0x40] sm:$0xff]  ;;  %v47_v13 = vld [vmem:[%s484_s2 + $0x48] sm:$0xff] }
   0x5   :  { %106 = vperm.xlu2 %354, %v48_v8   ;;  %v342_v14 = vld [vmem:[%s486_s1 + $0x8] sm:$0xff]  ;;  %v345_v15 = vld [vmem:[%s486_s1 + $0x20] sm:$0xff]  ;;  %v348_v16 = vld [vmem:[%s486_s1 + $0x38] sm:$0xff] }
   0x6   :  { %333 = vmatmul.msk.bf16.vlgmr.msra.gmra.mxu0 %vm174_vm1, %v341_v4  ;;  %336 = vmatmul.msk.bf16.vlgmr.msra.gmra.mxu2 %vm174_vm1, %v344_v5  ;;  %v44_v17 = vld [vmem:[%s484_s2 + $0x30] sm:$0xff]  ;;  %v45_v18 = vld [vmem:[%s484_s2 + $0x38] sm:$0xff]  ;;  %v42_v19 = vld [vmem:[%s484_s2 + $0x20] sm:$0xff] }
   0x7   :  { %339 = vmatmul.msk.bf16.vlgmr.msra.gmra.mxu3 %vm174_vm1, %v347_v7  ;;  %v43_v20 = vld [vmem:[%s484_s2 + $0x28] sm:$0xff]  ;;  %v40_v21 = vld [vmem:[%s484_s2 + $0x10] sm:$0xff]  ;;  %v41_v22 = vld [vmem:[%s484_s2 + $0x18] sm:$0xff] }
   0x8   :  { %v343_v23 = vld [vmem:[%s486_s1 + $0x10] sm:$0xff]  ;;  %v346_v24 = vld [vmem:[%s486_s1 + $0x28] sm:$0xff]  ;;  %v38_v25 = vld [vmem:[%s484_s2] sm:$0xff] }
   0x9   :  { %v39_v26 = vld [vmem:[%s484_s2 + $0x8] sm:$0xff]  ;;  %v277_v27 = vld [vmem:[%s487_s4] sm:$0xff] }
   0xa   :  { %131 = vperm.xlu0 %352, %v53_v9  }
   0xc   :  { %121 = vperm.xlu1 %353, %v51_v10  }
   0xd   :  { %111 = vperm.xlu2 %354, %v49_v11  }
  0x12   :  { %96 = vperm.xlu0 %352, %v46_v12  }
  0x14   :  { %101 = vperm.xlu1 %353, %v47_v13  }
  0x15   :  { %86 = vperm.xlu2 %354, %v44_v17  }
  0x16   :  { %334 = vmatmul.msk.bf16.gmra.mxu0 %vm174_vm1, %v342_v14  ;;  %337 = vmatmul.msk.bf16.gmra.mxu2 %vm174_vm1, %v345_v15 }
  0x17   :  { %340 = vmatmul.msk.bf16.gmra.mxu3 %vm174_vm1, %v348_v16 }
  0x1a   :  { %91 = vperm.xlu0 %352, %v45_v18  }
  0x1c   :  { %76 = vperm.xlu1 %353, %v42_v19  }
  0x1d   :  { %81 = vperm.xlu2 %354, %v43_v20  }
  0x22   :  { %66 = vperm.xlu0 %352, %v40_v21  }
  0x24   :  { %71 = vperm.xlu1 %353, %v41_v22  }
  0x25   :  { %56 = vperm.xlu2 %354, %v38_v25  }
  0x26   :  { %335 = vmatmul.msk.bf16.gmra.mxu0 %vm174_vm1, %v343_v23  ;;  %338 = vmatmul.msk.bf16.gmra.mxu2 %vm174_vm1, %v346_v24 }
  0x2a   :  { %61 = vperm.xlu0 %352, %v39_v26  }
  0x2c   :  { %280 = vperm.xlu1 %353, %v277_v27  }
  0x5f   :  { %v107_v37 = vpop.permute.xlu2 %106 }
  0x67   :  { %v112_v46 = vpop.permute.xlu2 %111 }
  0x6f   :  { %v87_v60 = vpop.permute.xlu2 %86 }
  0x74   :  { %v127_v31 = vpop.permute.xlu0 %126 }
  0x76   :  { %v117_v35 = vpop.permute.xlu1 %116 }
  0x77   :  { %v82_v10 = vpop.permute.xlu2 %81 }
  0x7c   :  { %v132_v36 = vpop.permute.xlu0 %131 }
  0x7e   :  { %v122_v41 = vpop.permute.xlu1 %121 }
  0x7f   :  { %v57_v26 = vpop.permute.xlu2 %56 }
  0x83   :  { %v472_v28 = vpop.f32.mrf.mxu0 }
  0x84   :  { %v97_v42 = vpop.permute.xlu0 %96 }
  0x86   :  { %v102_v56 = vpop.permute.xlu1 %101 }
  0x89   :  { %v227_v29 = vpop.f32.mrf.mxu2 }
  0x8a   :  { %v242_v30 = vpop.f32.mrf.mxu3  ;;  %v228_v12 = vadd.f32 %v227_v29, %v87_v60 }
  0x8b   :  { %v474_v32 = vpop.f32.mrf.mxu0  ;;  %v243_v47 = vadd.f32 %v242_v30, %v117_v35 }
  0x8c   :  { %v92_v58 = vpop.permute.xlu0 %91  ;;  %v258_v17 = vmax.f32 %v228_v12, 0.0 }
  0x8d   :  { %v264_v53 = vmax.f32 %v243_v47, 0.0 }
  0x8e   :  { %v77_v2 = vpop.permute.xlu1 %76 }
  0x91   :  { %v229_v33 = vpop.f32.mrf.mxu2 }
  0x92   :  { %v244_v34 = vpop.f32.mrf.mxu3  ;;  %v230_v7 = vadd.f32 %v229_v33, %v92_v58  ;;  %v213_v33 = vadd.f32 %v472_v28, %v57_v26 }
  0x93   :  { %v217_v38 = vpop.f32.mrf.mxu0  ;;  %v245_v48 = vadd.f32 %v244_v34, %v122_v41 }
  0x94   :  { %v67_v6 = vpop.permute.xlu0 %66  ;;  %v259_v14 = vmax.f32 %v230_v7, 0.0 }
  0x95   :  { %v265_v54 = vmax.f32 %v245_v48, 0.0  ;;  %v218_v20 = vadd.f32 %v217_v38, %v67_v6  ;;  %v268_v38 = vld [vmem:[%s488_s3] sm:$0xf] }
  0x96   :  { %v72_v19 = vpop.permute.xlu1 %71  ;;  %v272_v23 = vpack.c.bf16 %v259_v14, %v258_v17 }
  0x97   :  { %v275_v59 = vpack.c.bf16 %v265_v54, %v264_v53  ;;  %v254_v27 = vmax.f32 %v218_v20, 0.0 }
  0x99   :  { %v232_v39 = vpop.f32.mrf.mxu2 }
  0x9a   :  { %v247_v40 = vpop.f32.mrf.mxu3  ;;  %v233_v3 = vadd.f32 %v232_v39, %v97_v42 }
  0x9b   :  { %v248_v43 = vadd.f32 %v247_v40, %v127_v31  ;;  %v219_v49 = vpop.f32.mrf.mxu0 }
  0x9c   :  { %v260_v13 = vmax.f32 %v233_v3, 0.0  ;;  %v220_v21 = vadd.f32 %v219_v49, %v72_v19  ;;  %v62_v24 = vpop.permute.xlu0 %61 }
  0x9d   :  { %v266_v51 = vmax.f32 %v248_v43, 0.0  ;;  %v215_v29 = vadd.f32 %v474_v32, %v62_v24 }
  0x9e   :  { %v255_v30 = vmax.f32 %v220_v21, 0.0  ;;  %v281_v39 = vpop.permute.xlu1 %280 }
  0x9f   :  { %v253_v34 = vmax.f32 %v215_v29, 0.0 }
  0xa0   :  { %v270_v35 = vpack.c.bf16 %v255_v30, %v254_v27 }
  0xa1   :  { %v234_v44 = vpop.f32.mrf.mxu2 }
  0xa2   :  { %v249_v45 = vpop.f32.mrf.mxu3  ;;  %v235_v0 = vadd.f32 %v234_v44, %v102_v56 }
  0xa3   :  { %v250_v50 = vadd.f32 %v249_v45, %v132_v36  ;;  %v222_v61 = vpop.f32.mrf.mxu0  ;;  %v252_v36 = vmax.f32 %v213_v33, 0.0 }
  0xa4   :  { %v261_v8 = vmax.f32 %v235_v0, 0.0  ;;  %v223_v18 = vadd.f32 %v222_v61, %v77_v2 }
  0xa5   :  { %v267_v52 = vmax.f32 %v250_v50, 0.0 }
  0xa6   :  { %v273_v16 = vpack.c.bf16 %v261_v8, %v260_v13  ;;  %v256_v25 = vmax.f32 %v223_v18, 0.0 }
  0xa7   :  { %v276_v55 = vpack.c.bf16 %v267_v52, %v266_v51 }
  0xa9   :  { %283 = vmatpush.bf16.msra.mxu1 %v276_v55  ;;  %v237_v57 = vpop.f32.mrf.mxu2 }
  0xaa   :  { %v238_v62 = vadd.f32 %v237_v57, %v107_v37  ;;  %v269_v37 = vpack.c.bf16 %v253_v34, %v252_v36 }
  0xab   :  { %v224_v11 = vpop.f32.mrf.mxu0 }
  0xac   :  { %v262_v4 = vmax.f32 %v238_v62, 0.0  ;;  %v225_v15 = vadd.f32 %v224_v11, %v82_v10 }
  0xad   :  { %284 = vmatpush.bf16.msra.mxu1 %v275_v59 }
  0xae   :  { %v257_v22 = vmax.f32 %v225_v15, 0.0 }
  0xb0   :  { %v271_v31 = vpack.c.bf16 %v257_v22, %v256_v25 }
  0xb1   :  { %v239_v63 = vpop.f32.mrf.mxu2 }
  0xb2   :  { %v240_v1 = vadd.f32 %v239_v63, %v112_v46 }
  0xb4   :  { %v263_v5 = vmax.f32 %v240_v1, 0.0 }
  0xb6   :  { %v274_v9 = vpack.c.bf16 %v263_v5, %v262_v4 }
  0xb8   :  { %285 = vmatpush.bf16.msra.mxu1 %v274_v9 }
  0xbc   :  { %286 = vmatpush.bf16.msra.mxu1 %v273_v16 }
  0xc0   :  { %287 = vmatpush.bf16.msra.mxu1 %v272_v23 }
  0xc4   :  { %288 = vmatpush.bf16.msra.mxu1 %v271_v31 }
  0xc8   :  { %289 = vmatpush.bf16.msra.mxu1 %v270_v35 }
  0xcc   :  { %290 = vmatpush.bf16.msra.mxu1 %v269_v37 }
  0xcf   :  { %291 = vmatmul.bf16.vlgmr.msra.gmra.mxu1 %v268_v38 }
 0x14c   :  { %v292_v40 = vpop.f32.mrf.mxu1 }
 0x14d   :  { %v293_v41 = vadd.f32 %v292_v40, %v281_v39 }
 0x14f   :  { %296 = vst [vmem:[%s489_s5] sm:$0xff] %v293_v41 }
 0x154   :  { %v294_v28 = vpop.f32.mrf.mxu1 }

</bundles_post_ra>
